<compile_context>
chip_gen: v7x
topology: tpu7x:2x2x1
jax: 0.10.0
libtpu: 0.0.40
codegen_flags: <defaults>
</compile_context>

<pallas_src>
import functools

import jax
import jax.numpy as jnp
from jax import lax
from jax.experimental import pallas as pl
from jax.experimental.pallas import tpu as pltpu


# ---------------------------------------------------------------------------
# Helpers
# ---------------------------------------------------------------------------
def _recip(x):
    """EUP approx reciprocal + one Newton step (rel err ~ eps^2 << 1e-5)."""
    r = pl.reciprocal(x, approx=True)
    return r * (2.0 - x * r)


# ---------------------------------------------------------------------------
# Kernels
# ---------------------------------------------------------------------------
def encode_project_kernel(x_ref, we_ref, be_ref, wbwT_ref, wd_ref,
                          bwm_ref, p_ref, acc_ref, *, mu):
    """Fused encoder + bandwidth head + basis projection.

    Grid axis = the N contraction, tiled.  enc accumulates in a VMEM scratch;
    at the last step we add the bias, evaluate the bandwidth head and emit
    both bw_m = affine(sigmoid(enc @ Wbw.T)) and P = enc @ Wd.
    """
    k = pl.program_id(0)

    @pl.when(k == 0)
    def _():
        acc_ref[...] = jnp.zeros_like(acc_ref)

    # Partial contraction over this N tile on the MXU.  We is passed
    # untransposed (n, N); contract dim 1 of both operands (== x @ We.T).
    acc_ref[...] += lax.dot_general(
        x_ref[...], we_ref[...],
        dimension_numbers=(((1,), (1,)), ((), ())),
        preferred_element_type=jnp.float32,
    )

    @pl.when(k == pl.num_programs(0) - 1)
    def _():
        enc = acc_ref[...] + be_ref[...]                         # (b, n)
        # Bandwidth head (tiny): sigmoid(enc @ Wbw.T), affine remap.
        bwm = jax.nn.sigmoid(
            jnp.dot(enc, wbwT_ref[...], preferred_element_type=jnp.float32))
        a = 1.0 / 60.0 - 2.0 / 60.0 / mu
        c = 2.0 / 60.0 / mu
        bwm_ref[...] = a * bwm + c                               # (b, m)
        # Projected basis P = enc @ Wd, written once (Wd resident).
        p_ref[...] = jnp.dot(enc, wd_ref[...],
                             preferred_element_type=jnp.float32)  # (b, N)


def decode_kernel(bwm_ref, lbl_ref, dsq_ref, pg_ref, out_ref, *, m):
    """Bubble window + normalized K-reduce against the pre-projected basis.

    bwm: (b, m)          per-cluster bandwidths (resident)
    lbl: (1, tile_n)     int32 clustering labels for this tile
    dsq: (K, tile_n)     precomputed (d/mu)^2, neighbours on the sublane axis
    pg:  (b, K, tile_n)  P gathered at neighbour_id
    out: (b, tile_n)
    """
    lbl = lbl_ref[...]
    bwm = bwm_ref[...]
    b = bwm.shape[0]
    tile_n = lbl.shape[1]

    # In-kernel clustering_labels gather: m unrolled compare/selects (VPU).
    bw = jnp.zeros((b, tile_n), jnp.float32)
    for c in range(m):
        bw = jnp.where(lbl == c, bwm[:, c:c + 1], bw)            # (b, tile_n)

    # bubble window: relu(1 - (d/mu)^2 / w^2)
    inv_w2 = _recip(bw * bw)                                     # (b, tile_n)
    window = jnp.maximum(
        1.0 - dsq_ref[...][None, :, :] * inv_w2[:, None, :], 0.0
    )                                                            # (b, K, tile_n)

    # Normalize AFTER the K reduction: sum_k(win*pg) / sum_k(win)
    # (same math as normalizing the window first; sublane reduces on XLU).
    pg = pg_ref[...]
    num = jnp.sum(window * pg, axis=1)                           # (b, tile_n)
    den = jnp.sum(window, axis=1)                                # (b, tile_n)
    # NOTE: like the reference, den == 0 (no neighbour inside the bubble)
    # would produce non-finite output; semantics kept identical on purpose.
    out_ref[...] = num * _recip(den)


# ---------------------------------------------------------------------------
# One-time host-side preprocessing (module-__init__ equivalents)
# ---------------------------------------------------------------------------
def prepare_params(params):
    """Static param layout prep: bias as a row, Wbw pre-transposed."""
    We, be, Wd, Wbw = params
    return (We, be.reshape(1, -1), Wd, Wbw.T)


def precompute_graph(neighbour_id, neighbour_distance, clustering_labels, mu):
    """Static per-graph tensors: nid.T, (d/mu)^2 transposed, labels row."""
    nid_T = jnp.asarray(neighbour_id, jnp.int32).T                       # (K, N)
    dsq_T = (jnp.asarray(neighbour_distance, jnp.float32).T ** 2) / (mu * mu)
    labels_row = jnp.asarray(clustering_labels, jnp.int32).reshape(1, -1)  # (1, N)
    return nid_T, dsq_T, labels_row


# ---------------------------------------------------------------------------
# Forward (2 pallas_calls + 1 XLA gather, all under one jit)
# ---------------------------------------------------------------------------
def nrbs_forward(x, prepped_params, graph, mu, tile_n=512):
    We, be_row, Wd, WbwT = prepped_params       # (n,N), (1,n), (n,N), (n,m)
    nid_T, dsq_T, labels_row = graph            # (K,N), (K,N), (1,N)
    b, N = x.shape
    n = We.shape[0]
    m = WbwT.shape[1]
    K = nid_T.shape[0]

    tile_n = min(tile_n, N)
    assert N % tile_n == 0, "N must be a multiple of tile_n"
    grid_n = N // tile_n    # keep even where possible (v7x: 2 TensorCores)

    # ---- fused encode + bandwidth head + projection ------------------------
    bw_m, p = pl.pallas_call(
        functools.partial(encode_project_kernel, mu=mu),
        out_shape=(
            jax.ShapeDtypeStruct((b, m), jnp.float32),
            jax.ShapeDtypeStruct((b, N), jnp.float32),
        ),
        grid_spec=pltpu.PrefetchScalarGridSpec(
            num_scalar_prefetch=0,
            grid=(grid_n,),
            in_specs=[
                pl.BlockSpec((b, tile_n), lambda k: (0, k)),   # x tile
                pl.BlockSpec((n, tile_n), lambda k: (0, k)),   # We tile
                pl.BlockSpec((1, n), lambda k: (0, 0)),        # bias (resident)
                pl.BlockSpec((n, m), lambda k: (0, 0)),        # Wbw.T (resident)
                pl.BlockSpec((n, N), lambda k: (0, 0)),        # Wd (resident, n*N*4 B)
            ],
            out_specs=[
                pl.BlockSpec((b, m), lambda k: (0, 0)),        # bw_m
                pl.BlockSpec((b, N), lambda k: (0, 0)),        # P (written at finalize)
            ],
            scratch_shapes=[pltpu.VMEM((b, n), jnp.float32)],  # enc accumulator
        ),
        compiler_params=pltpu.CompilerParams(
            dimension_semantics=("arbitrary",)),               # reduction axis
    )(x, We, be_row, WbwT, Wd)

    # ---- glue gather (data-dependent; no robust in-kernel lowering) --------
    # TODO(synk): gather P at neighbour_id inside the decode kernel (resident
    # P + lane gather, or pltpu.roll for circulant graphs) once supported.
    pg = jnp.take(p, nid_T, axis=1)                            # (b, K, N)

    # ---- decode hot path, tiled over N -------------------------------------
    # Accurate per-step estimate: labels + dsq + pg + out blocks (bw_m is a
    # tiny resident block), double-buffered, plus headroom for compiler
    # scratch.  Cap at 32 MiB so the same config is safe on v7x (64 MiB).
    dec_step_bytes = 4 * tile_n * (1 + K + b * K + b)
    dec_vmem = int(min(32 << 20, 2 * dec_step_bytes + (4 << 20)))

    out = pl.pallas_call(
        functools.partial(decode_kernel, m=m),
        out_shape=jax.ShapeDtypeStruct((b, N), jnp.float32),
        grid_spec=pltpu.PrefetchScalarGridSpec(
            num_scalar_prefetch=0,
            grid=(grid_n,),
            in_specs=[
                pl.BlockSpec((b, m), lambda j: (0, 0)),            # bw_m (resident)
                pl.BlockSpec((1, tile_n), lambda j: (0, j)),       # labels tile
                pl.BlockSpec((K, tile_n), lambda j: (0, j)),       # (d/mu)^2 tile
                pl.BlockSpec((b, K, tile_n), lambda j: (0, 0, j)), # gathered basis
            ],
            out_specs=pl.BlockSpec((b, tile_n), lambda j: (0, j)),
        ),
        compiler_params=pltpu.CompilerParams(
            dimension_semantics=("parallel",),   # N-tiles shard across v7x TCs
            vmem_limit_bytes=dec_vmem,
        ),
    )(bw_m, labels_row, dsq_T, pg)
    return out


# ---------------------------------------------------------------------------
# Pure-JAX reference (mirrors the PyTorch forward) for validation
# ---------------------------------------------------------------------------
def nrbs_reference(x, params, neighbour_id, neighbour_distance, clustering_labels, mu):
    We, be, Wd, Wbw = params
    enc = x @ We.T + be                                        # encoder
    bw = jax.nn.sigmoid(enc @ Wbw.T)                           # bandwidth_layers
    bw = (1.0 / 60.0 - 2.0 / 60.0 / mu) * bw + 2.0 / 60.0 / mu
    bw_full = bw[:, clustering_labels]                         # (b, N)
    d = neighbour_distance                                     # (N, K)
    outs = []
    for i in range(x.shape[0]):
        w = bw_full[i]                                         # (N,)
        window = jnp.maximum(1.0 - d ** 2 / (w[:, None] * mu) ** 2, 0.0)  # (N,K)
        window = window / jnp.sum(window, axis=-1, keepdims=True)
        Wg = Wd[:, neighbour_id]                               # (n, N, K)
        conv = jnp.sum(Wg * window[None, :, :], axis=-1)       # (n, N)
        outs.append(enc[i] @ conv)
    return jnp.stack(outs)


# ---------------------------------------------------------------------------
# Main
# ---------------------------------------------------------------------------
if __name__ == "__main__":
    # Small shapes consistent with the module's forward; N chosen so the
    # decode grid has an even number (2) of 512-wide N-tiles.
    N, n, mu, m = 1024, 8, 5.0, 4
    K = 8        # neighbours per node (fills the sublane axis)
    b = 2        # batch

    key = jax.random.PRNGKey(0)
    k_x, k_we, k_be, k_wd, k_wbw, k_d = jax.random.split(key, 6)

    # Deterministic parameter init (PyTorch-Linear-style uniform ranges).
    bnd_N = 1.0 / jnp.sqrt(jnp.float32(N))
    bnd_n = 1.0 / jnp.sqrt(jnp.float32(n))
    We = jax.random.uniform(k_we, (n, N), jnp.float32, -bnd_N, bnd_N)   # encoder.weight
    be = jax.random.uniform(k_be, (n,), jnp.float32, -bnd_N, bnd_N)     # encoder.bias
    Wd = jax.random.uniform(k_wd, (n, N), jnp.float32, -bnd_N, bnd_N)   # decoder.weight
    Wbw = jax.random.uniform(k_wbw, (m, n), jnp.float32, -bnd_n, bnd_n) # bandwidth_layers.weight
    params = (We, be, Wd, Wbw)

    # Deterministic graph structure.
    neighbour_id = ((jnp.arange(N)[:, None] + jnp.arange(K)[None, :]) % N
                    ).astype(jnp.int32)                                   # (N, K)
    neighbour_distance = jax.random.uniform(
        k_d, (N, K), jnp.float32, 0.001, 0.02
    ).at[:, 0].set(0.0)                                                   # self-distance 0
    clustering_labels = (jnp.arange(N) % m).astype(jnp.int32)             # (N,)

    x = jax.random.normal(k_x, (b, N), jnp.float32)

    # One-time (per-model / per-graph) host preprocessing.
    prepped = prepare_params(params)
    graph = precompute_graph(neighbour_id, neighbour_distance, clustering_labels, mu)

    # Whole forward under one jit: both pallas_calls + the glue gather
    # dispatch as a single executable.
    fwd = jax.jit(functools.partial(nrbs_forward, mu=mu, tile_n=512))

    out = fwd(x, prepped, graph)
    out = jax.block_until_ready(out)

    ref = nrbs_reference(
        x, params, neighbour_id, neighbour_distance, clustering_labels, mu
    )
    assert out.shape == (b, N)
    max_diff = jnp.max(jnp.abs(out - ref))
    assert jnp.allclose(out, ref, rtol=1e-4, atol=1e-5), (
        f"max abs diff = {max_diff}"
    )
    print("KERNEL_OK")
</pallas_src>

<mosaic_0001>
module attributes {stable_mosaic.version = 11 : i64} {
  func.func @encode_project_kernel(%arg0: i32, %arg1: memref<2x512xf32, #tpu.memory_space<vmem>>, %arg2: memref<8x512xf32, #tpu.memory_space<vmem>>, %arg3: memref<1x8xf32, #tpu.memory_space<vmem>>, %arg4: memref<8x4xf32, #tpu.memory_space<vmem>>, %arg5: memref<8x1024xf32, #tpu.memory_space<vmem>>, %arg6: memref<2x4xf32, #tpu.memory_space<vmem>>, %arg7: memref<2x1024xf32, #tpu.memory_space<vmem>>, %arg8: memref<2x8xf32, #tpu.memory_space<vmem>>) attributes {dimension_semantics = [#tpu.dimension_semantics<arbitrary>], iteration_bounds = array<i64: 2>, scalar_prefetch = 0 : i64, scratch_operands = 1 : i64, tpu.core_type = #tpu.core_type<tc>, window_params = [{transform_indices = @transform_0, window_bounds = array<i64: 2, 512>}, {transform_indices = @transform_1, window_bounds = array<i64: 8, 512>}, {pipeline_mode = #tpu.pipeline_mode<synchronous>, transform_indices = @transform_2, window_bounds = array<i64: 1, 8>}, {pipeline_mode = #tpu.pipeline_mode<synchronous>, transform_indices = @transform_3, window_bounds = array<i64: 8, 4>}, {pipeline_mode = #tpu.pipeline_mode<synchronous>, transform_indices = @transform_4, window_bounds = array<i64: 8, 1024>}, {pipeline_mode = #tpu.pipeline_mode<synchronous>, transform_indices = @transform_5, window_bounds = array<i64: 2, 4>}, {pipeline_mode = #tpu.pipeline_mode<synchronous>, transform_indices = @transform_6, window_bounds = array<i64: 2, 1024>}]} {
    %c0_i32 = arith.constant 0 : i32
    %0 = arith.cmpi eq, %arg0, %c0_i32 : i32
    %1 = arith.extui %0 : i1 to i32
    %c0_i32_0 = arith.constant 0 : i32
    %2 = arith.cmpi ne, %1, %c0_i32_0 : i32
    scf.if %2 {
      %cst_9 = arith.constant 0.000000e+00 : f32
      %12 = vector.broadcast %cst_9 : f32 to vector<2x8xf32>
      %c0_10 = arith.constant 0 : index
      %c0_11 = arith.constant 0 : index
      %13 = vector.load %arg8[%c0_10, %c0_11] : memref<2x8xf32, #tpu.memory_space<vmem>>, vector<2x8xf32>
      tpu.vector_store %arg8[%c0_10, %c0_11], %12 {strides = array<i32>} : memref<2x8xf32, #tpu.memory_space<vmem>>, vector<2x8xf32>,
    } else {
    }
    %c0 = arith.constant 0 : index
    %c0_1 = arith.constant 0 : index
    %3 = vector.load %arg8[%c0, %c0_1] : memref<2x8xf32, #tpu.memory_space<vmem>>, vector<2x8xf32>
    %c0_2 = arith.constant 0 : index
    %c0_3 = arith.constant 0 : index
    %4 = vector.load %arg1[%c0_2, %c0_3] : memref<2x512xf32, #tpu.memory_space<vmem>>, vector<2x512xf32>
    %c0_4 = arith.constant 0 : index
    %c0_5 = arith.constant 0 : index
    %5 = vector.load %arg2[%c0_4, %c0_5] : memref<8x512xf32, #tpu.memory_space<vmem>>, vector<8x512xf32>
    %cst = arith.constant dense<0.000000e+00> : vector<2x8xf32>
    %6 = tpu.matmul %4, %5, %cst {dimension_numbers = #tpu.dot_dimension_numbers<[1], [1], [0], [0], [0, 0, 1, 0], [], []>} : vector<2x512xf32>, vector<8x512xf32>, vector<2x8xf32> -> vector<2x8xf32>
    %7 = arith.addf %3, %6 : vector<2x8xf32>
    %c0_6 = arith.constant 0 : index
    %c0_7 = arith.constant 0 : index
    %8 = vector.load %arg8[%c0_6, %c0_7] : memref<2x8xf32, #tpu.memory_space<vmem>>, vector<2x8xf32>
    tpu.vector_store %arg8[%c0_6, %c0_7], %7 {strides = array<i32>} : memref<2x8xf32, #tpu.memory_space<vmem>>, vector<2x8xf32>,
    %c1_i32 = arith.constant 1 : i32
    %9 = arith.cmpi eq, %arg0, %c1_i32 : i32
    %10 = arith.extui %9 : i1 to i32
    %c0_i32_8 = arith.constant 0 : i32
    %11 = arith.cmpi ne, %10, %c0_i32_8 : i32
    scf.if %11 {
      %c0_9 = arith.constant 0 : index
      %c0_10 = arith.constant 0 : index
      %12 = vector.load %arg8[%c0_9, %c0_10] : memref<2x8xf32, #tpu.memory_space<vmem>>, vector<2x8xf32>
      %c0_11 = arith.constant 0 : index
      %c0_12 = arith.constant 0 : index
      %13 = vector.load %arg3[%c0_11, %c0_12] : memref<1x8xf32, #tpu.memory_space<vmem>>, vector<1x8xf32>
      %14 = vector.broadcast %13 : vector<1x8xf32> to vector<2x8xf32>
      %15 = arith.addf %12, %14 : vector<2x8xf32>
      %c0_13 = arith.constant 0 : index
      %c0_14 = arith.constant 0 : index
      %16 = vector.load %arg4[%c0_13, %c0_14] : memref<8x4xf32, #tpu.memory_space<vmem>>, vector<8x4xf32>
      %cst_15 = arith.constant dense<0.000000e+00> : vector<2x4xf32>
      %17 = tpu.matmul %15, %16, %cst_15 {dimension_numbers = #tpu.dot_dimension_numbers<[1], [0], [0], [1], [0, 0, 1, 1], [], []>} : vector<2x8xf32>, vector<8x4xf32>, vector<2x4xf32> -> vector<2x4xf32>
      %18 = arith.negf %17 : vector<2x4xf32>
      %19 = math.exp %18 : vector<2x4xf32>
      %cst_16 = arith.constant 1.000000e+00 : f32
      %20 = vector.broadcast %cst_16 : f32 to vector<2x4xf32>
      %21 = arith.addf %20, %19 : vector<2x4xf32>
      %22 = arith.divf %20, %21 : vector<2x4xf32>
      %cst_17 = arith.constant 0.00999999977 : f32
      %23 = vector.broadcast %cst_17 : f32 to vector<2x4xf32>
      %24 = arith.mulf %23, %22 : vector<2x4xf32>
      %cst_18 = arith.constant 0.00666666683 : f32
      %25 = vector.broadcast %cst_18 : f32 to vector<2x4xf32>
      %26 = arith.addf %24, %25 : vector<2x4xf32>
      %c0_19 = arith.constant 0 : index
      %c0_20 = arith.constant 0 : index
      %27 = vector.load %arg6[%c0_19, %c0_20] : memref<2x4xf32, #tpu.memory_space<vmem>>, vector<2x4xf32>
      tpu.vector_store %arg6[%c0_19, %c0_20], %26 {strides = array<i32>} : memref<2x4xf32, #tpu.memory_space<vmem>>, vector<2x4xf32>,
      %c0_21 = arith.constant 0 : index
      %c0_22 = arith.constant 0 : index
      %28 = vector.load %arg5[%c0_21, %c0_22] : memref<8x1024xf32, #tpu.memory_space<vmem>>, vector<8x1024xf32>
      %cst_23 = arith.constant dense<0.000000e+00> : vector<2x1024xf32>
      %29 = tpu.matmul %15, %28, %cst_23 {dimension_numbers = #tpu.dot_dimension_numbers<[1], [0], [0], [1], [0, 0, 1, 1], [], []>} : vector<2x8xf32>, vector<8x1024xf32>, vector<2x1024xf32> -> vector<2x1024xf32>
      %c0_24 = arith.constant 0 : index
      %c0_25 = arith.constant 0 : index
      %30 = vector.load %arg7[%c0_24, %c0_25] : memref<2x1024xf32, #tpu.memory_space<vmem>>, vector<2x1024xf32>
      tpu.vector_store %arg7[%c0_24, %c0_25], %29 {strides = array<i32>} : memref<2x1024xf32, #tpu.memory_space<vmem>>, vector<2x1024xf32>,
    } else {
    }
    return
  }
  func.func @transform_0(%arg0: i32) -> (i32, i32) {
    %c0_i32 = arith.constant 0 : i32
    %c0_i32_0 = arith.constant 0 : i32
    return %c0_i32, %arg0 : i32, i32
  }
  func.func @transform_1(%arg0: i32) -> (i32, i32) {
    %c0_i32 = arith.constant 0 : i32
    %c0_i32_0 = arith.constant 0 : i32
    return %c0_i32, %arg0 : i32, i32
  }
  func.func @transform_2(%arg0: i32) -> (i32, i32) {
    %c0_i32 = arith.constant 0 : i32
    %c0_i32_0 = arith.constant 0 : i32
    %c0_i32_1 = arith.constant 0 : i32
    return %c0_i32, %c0_i32_0 : i32, i32
  }
  func.func @transform_3(%arg0: i32) -> (i32, i32) {
    %c0_i32 = arith.constant 0 : i32
    %c0_i32_0 = arith.constant 0 : i32
    %c0_i32_1 = arith.constant 0 : i32
    return %c0_i32, %c0_i32_0 : i32, i32
  }
  func.func @transform_4(%arg0: i32) -> (i32, i32) {
    %c0_i32 = arith.constant 0 : i32
    %c0_i32_0 = arith.constant 0 : i32
    %c0_i32_1 = arith.constant 0 : i32
    return %c0_i32, %c0_i32_0 : i32, i32
  }
  func.func @transform_5(%arg0: i32) -> (i32, i32) {
    %c0_i32 = arith.constant 0 : i32
    %c0_i32_0 = arith.constant 0 : i32
    %c0_i32_1 = arith.constant 0 : i32
    return %c0_i32, %c0_i32_0 : i32, i32
  }
  func.func @transform_6(%arg0: i32) -> (i32, i32) {
    %c0_i32 = arith.constant 0 : i32
    %c0_i32_0 = arith.constant 0 : i32
    %c0_i32_1 = arith.constant 0 : i32
    return %c0_i32, %c0_i32_0 : i32, i32
  }
}

module attributes {stable_mosaic.version = 11 : i64} {
  func.func @decode_kernel(%arg0: i32, %arg1: memref<2x4xf32, #tpu.memory_space<vmem>>, %arg2: memref<1x512xi32, #tpu.memory_space<vmem>>, %arg3: memref<8x512xf32, #tpu.memory_space<vmem>>, %arg4: memref<2x8x512xf32, #tpu.memory_space<vmem>>, %arg5: memref<2x512xf32, #tpu.memory_space<vmem>>) attributes {dimension_semantics = [#tpu.dimension_semantics<parallel>], iteration_bounds = array<i64: 2>, scalar_prefetch = 0 : i64, scratch_operands = 0 : i64, tpu.core_type = #tpu.core_type<tc>, window_params = [{pipeline_mode = #tpu.pipeline_mode<synchronous>, transform_indices = @transform_0, window_bounds = array<i64: 2, 4>}, {transform_indices = @transform_1, window_bounds = array<i64: 1, 512>}, {transform_indices = @transform_2, window_bounds = array<i64: 8, 512>}, {transform_indices = @transform_3, window_bounds = array<i64: 2, 8, 512>}, {transform_indices = @transform_4, window_bounds = array<i64: 2, 512>}]} {
    %c0 = arith.constant 0 : index
    %c0_0 = arith.constant 0 : index
    %0 = vector.load %arg2[%c0, %c0_0] : memref<1x512xi32, #tpu.memory_space<vmem>>, vector<1x512xi32>
    %c0_1 = arith.constant 0 : index
    %c0_2 = arith.constant 0 : index
    %1 = vector.load %arg1[%c0_1, %c0_2] : memref<2x4xf32, #tpu.memory_space<vmem>>, vector<2x4xf32>
    %cst = arith.constant 0.000000e+00 : f32
    %2 = vector.broadcast %cst : f32 to vector<2x512xf32>
    %c0_i32 = arith.constant 0 : i32
    %3 = vector.broadcast %c0_i32 : i32 to vector<1x512xi32>
    %4 = arith.cmpi eq, %0, %3 : vector<1x512xi32>
    %5 = vector.extract_strided_slice %1 {offsets = [0, 0], sizes = [2, 1], strides = [1, 1]} : vector<2x4xf32> to vector<2x1xf32>
    %6 = vector.shape_cast %4 : vector<1x512xi1> to vector<1x512xi1>
    %7 = vector.broadcast %6 : vector<1x512xi1> to vector<2x512xi1>
    %8 = vector.shape_cast %5 : vector<2x1xf32> to vector<2x1xf32>
    %9 = vector.broadcast %8 : vector<2x1xf32> to vector<2x512xf32>
    %10 = arith.select %7, %9, %2 : vector<2x512xi1>, vector<2x512xf32>
    %c1_i32 = arith.constant 1 : i32
    %11 = vector.broadcast %c1_i32 : i32 to vector<1x512xi32>
    %12 = arith.cmpi eq, %0, %11 : vector<1x512xi32>
    %13 = vector.extract_strided_slice %1 {offsets = [0, 1], sizes = [2, 1], strides = [1, 1]} : vector<2x4xf32> to vector<2x1xf32>
    %14 = vector.shape_cast %12 : vector<1x512xi1> to vector<1x512xi1>
    %15 = vector.broadcast %14 : vector<1x512xi1> to vector<2x512xi1>
    %16 = vector.shape_cast %13 : vector<2x1xf32> to vector<2x1xf32>
    %17 = vector.broadcast %16 : vector<2x1xf32> to vector<2x512xf32>
    %18 = arith.select %15, %17, %10 : vector<2x512xi1>, vector<2x512xf32>
    %c2_i32 = arith.constant 2 : i32
    %19 = vector.broadcast %c2_i32 : i32 to vector<1x512xi32>
    %20 = arith.cmpi eq, %0, %19 : vector<1x512xi32>
    %21 = vector.extract_strided_slice %1 {offsets = [0, 2], sizes = [2, 1], strides = [1, 1]} : vector<2x4xf32> to vector<2x1xf32>
    %22 = vector.shape_cast %20 : vector<1x512xi1> to vector<1x512xi1>
    %23 = vector.broadcast %22 : vector<1x512xi1> to vector<2x512xi1>
    %24 = vector.shape_cast %21 : vector<2x1xf32> to vector<2x1xf32>
    %25 = vector.broadcast %24 : vector<2x1xf32> to vector<2x512xf32>
    %26 = arith.select %23, %25, %18 : vector<2x512xi1>, vector<2x512xf32>
    %c3_i32 = arith.constant 3 : i32
    %27 = vector.broadcast %c3_i32 : i32 to vector<1x512xi32>
    %28 = arith.cmpi eq, %0, %27 : vector<1x512xi32>
    %29 = vector.extract_strided_slice %1 {offsets = [0, 3], sizes = [2, 1], strides = [1, 1]} : vector<2x4xf32> to vector<2x1xf32>
    %30 = vector.shape_cast %28 : vector<1x512xi1> to vector<1x512xi1>
    %31 = vector.broadcast %30 : vector<1x512xi1> to vector<2x512xi1>
    %32 = vector.shape_cast %29 : vector<2x1xf32> to vector<2x1xf32>
    %33 = vector.broadcast %32 : vector<2x1xf32> to vector<2x512xf32>
    %34 = arith.select %31, %33, %26 : vector<2x512xi1>, vector<2x512xf32>
    %35 = arith.mulf %34, %34 : vector<2x512xf32>
    %36 = tpu.reciprocal %35 {approx = true} : vector<2x512xf32> -> vector<2x512xf32>
    %37 = arith.mulf %35, %36 : vector<2x512xf32>
    %cst_3 = arith.constant 2.000000e+00 : f32
    %38 = vector.broadcast %cst_3 : f32 to vector<2x512xf32>
    %39 = arith.subf %38, %37 : vector<2x512xf32>
    %40 = arith.mulf %36, %39 : vector<2x512xf32>
    %c0_4 = arith.constant 0 : index
    %c0_5 = arith.constant 0 : index
    %41 = vector.load %arg3[%c0_4, %c0_5] : memref<8x512xf32, #tpu.memory_space<vmem>>, vector<8x512xf32>
    %42 = vector.shape_cast %41 : vector<8x512xf32> to vector<1x8x512xf32>
    %43 = vector.shape_cast %40 : vector<2x512xf32> to vector<2x1x512xf32>
    %44 = vector.broadcast %42 : vector<1x8x512xf32> to vector<2x8x512xf32>
    %45 = vector.broadcast %43 : vector<2x1x512xf32> to vector<2x8x512xf32>
    %46 = arith.mulf %44, %45 : vector<2x8x512xf32>
    %cst_6 = arith.constant 1.000000e+00 : f32
    %47 = vector.broadcast %cst_6 : f32 to vector<2x8x512xf32>
    %48 = arith.subf %47, %46 : vector<2x8x512xf32>
    %cst_7 = arith.constant 0.000000e+00 : f32
    %49 = vector.broadcast %cst_7 : f32 to vector<2x8x512xf32>
    %50 = arith.maximumf %48, %49 : vector<2x8x512xf32>
    %c0_8 = arith.constant 0 : index
    %c0_9 = arith.constant 0 : index
    %c0_10 = arith.constant 0 : index
    %51 = vector.load %arg4[%c0_8, %c0_9, %c0_10] : memref<2x8x512xf32, #tpu.memory_space<vmem>>, vector<2x8x512xf32>
    %52 = arith.mulf %50, %51 : vector<2x8x512xf32>
    %cst_11 = arith.constant dense<0.000000e+00> : vector<2x512xf32>
    %53 = vector.multi_reduction <add>, %52, %cst_11 [1] : vector<2x8x512xf32> to vector<2x512xf32>
    %cst_12 = arith.constant dense<0.000000e+00> : vector<2x512xf32>
    %54 = vector.multi_reduction <add>, %50, %cst_12 [1] : vector<2x8x512xf32> to vector<2x512xf32>
    %55 = tpu.reciprocal %54 {approx = true} : vector<2x512xf32> -> vector<2x512xf32>
    %56 = arith.mulf %54, %55 : vector<2x512xf32>
    %cst_13 = arith.constant 2.000000e+00 : f32
    %57 = vector.broadcast %cst_13 : f32 to vector<2x512xf32>
    %58 = arith.subf %57, %56 : vector<2x512xf32>
    %59 = arith.mulf %55, %58 : vector<2x512xf32>
    %60 = arith.mulf %53, %59 : vector<2x512xf32>
    %c0_14 = arith.constant 0 : index
    %c0_15 = arith.constant 0 : index
    %61 = vector.load %arg5[%c0_14, %c0_15] : memref<2x512xf32, #tpu.memory_space<vmem>>, vector<2x512xf32>
    tpu.vector_store %arg5[%c0_14, %c0_15], %60 {strides = array<i32>} : memref<2x512xf32, #tpu.memory_space<vmem>>, vector<2x512xf32>,
    return
  }
  func.func @transform_0(%arg0: i32) -> (i32, i32) {
    %c0_i32 = arith.constant 0 : i32
    %c0_i32_0 = arith.constant 0 : i32
    %c0_i32_1 = arith.constant 0 : i32
    return %c0_i32, %c0_i32_0 : i32, i32
  }
  func.func @transform_1(%arg0: i32) -> (i32, i32) {
    %c0_i32 = arith.constant 0 : i32
    %c0_i32_0 = arith.constant 0 : i32
    return %c0_i32, %arg0 : i32, i32
  }
  func.func @transform_2(%arg0: i32) -> (i32, i32) {
    %c0_i32 = arith.constant 0 : i32
    %c0_i32_0 = arith.constant 0 : i32
    return %c0_i32, %arg0 : i32, i32
  }
  func.func @transform_3(%arg0: i32) -> (i32, i32, i32) {
    %c0_i32 = arith.constant 0 : i32
    %c0_i32_0 = arith.constant 0 : i32
    %c0_i32_1 = arith.constant 0 : i32
    return %c0_i32, %c0_i32_0, %arg0 : i32, i32, i32
  }
  func.func @transform_4(%arg0: i32) -> (i32, i32) {
    %c0_i32 = arith.constant 0 : i32
    %c0_i32_0 = arith.constant 0 : i32
    return %c0_i32, %arg0 : i32, i32
  }
}

</mosaic_0001>

<bundles_post_ra>
// kernel: nrbs_forward.2
= control target key start
LH: loop header
LB: loop body
LE: loop exit
PB: predicated region body
PF: predicated region fallthrough
CT: control target
= control target key end

     0   :  { %12 = vsyncpa [#allocation4], 0  ;;  %s1576_s0 = inlined_call_operand.hbm [shape: f32[2,1024], index: 0, kind: input, shape index: {}]   ;;  %s1577_s1 = inlined_call_operand.hbm [shape: f32[8,1024], index: 1, kind: input, shape index: {}]   ;;  %s1578_s2 = inlined_call_operand.hbm [shape: f32[1,8], index: 2, kind: input, shape index: {}]   ;;  %s1579_s3 = inlined_call_operand.vmem [shape: f32[8,4], index: 3, kind: input, shape index: {}]   ;;  %s1580_s4 = inlined_call_operand.hbm [shape: f32[8,1024], index: 4, kind: input, shape index: {}]   ;;  %s1581_s5 = inlined_call_operand.vmem [shape: f32[2,4], index: 5, kind: output, shape index: {0}]   ;;  %s1582_s6 = inlined_call_operand.vmem [shape: f32[2,1024], index: 6, kind: output, shape index: {1}]  }
   0x1   :  { %14 = vsyncpa [#allocation4 + $0x1], 0 }
   0x2   :  { %15 = vsyncpa [#allocation6], 0 }
   0x3   :  { %17 = vsyncpa [#allocation6 + $0x1], 0 }
   0x4   :  { %18 = vsyncpa [#allocation9], 0  ;;  %s1335_s21 = smov 0   ;;  %s1337_s22 = smov 0  }
   0x5   :  { %s1339_s23 = smov 0   ;;  %s1341_s24 = smov 0  }
   0x6 LB: > { %s1354_s25 = sadd.s32 4294967295, %s1290_s24   ;;  %p44_p0 = scmp.ne.s32.totalorder %s1282_s22, %s1278_s21  ;;  %s1290_s24 = sphi %s1341_s24, %s1600_s24   ;;  %s1286_s23 = sphi %s1339_s23, %s1599_s23   ;;  %s1282_s22 = sphi %s1337_s22, %s1598_s22   ;;  %s1278_s21 = sphi %s1335_s21, %s1597_s21  }
   0x7   : > { %p1583_p1 = scmp.eq.s32.totalorder %s1354_s25, 0  ;;  %p1019_p2 = scmp.ge.s32.totalorder %s1290_s24, 1 }
   0x8   : > { %p186_p3 = scmp.lt.s32.totalorder %s1290_s24, 3  ;;  %s1292_s28 = smov [#allocation7]  }
   0x9   : > { %p1363_p5 = por %p1583_p1, %p44_p0  ;;  %s199_s29 = sshll.u32 %s1292_s28, 4  ;;  %s200_s29 = int_to_ptr.vmem [resolvable:$true] %s199_s29 }
   0xa   : > { %p1367_p6 = pnand %p1019_p2, %p186_p3  ;;  %s1293_s30 = smov [#allocation8]  }
   0xb   : > { %s1586_s26 = scalar_select %p1363_p5, 1, 0 }
   0xc   : > { %s1587_s27 = scalar_select %p1367_p6, 1, 0 }
   0xd   : > { %p1066_p7 = pneg %p1367_p6  ;;  %s213_s7 = sshll.u32 %s1293_s30, 4  ;;  %s1379_s7 = int_to_ptr.vmem [resolvable:$true] %s213_s7 }
   0xe   : > { %s1382_s9 = sadd.s32 1, %s1290_s24   ;;  %s1128_s13 = scalar_lea.hbm %s1578_s2, 16 }
   0xf   : > { %p1375_p8 = pnand %p1066_p7, %p1583_p1  ;;  %s28_s10 = ssub.s32 %s1290_s24, %s1382_s9 }
  0x10   : > { %p1129_p9 = scmp.ne.s32.totalorder %s1578_s2, %s1128_s13  ;;  %p1135_p13 = scmp.lt.u32.totalorder %s1128_s13, %s1578_s2 }
  0x11   : > { %p1130_p10 = pneg %p1375_p8 }
  0x13   : > { %p1131_p11 = pnand %p1130_p10, %p1129_p9 }
  0x15   : > { %p1132_p12 = pneg %p1131_p11 }
  0x17   : > { %p1137_p0 = pnand %p1135_p13, %p1132_p12 }
  0x19   : > { %1140 = shalt.err (!%p1137_p0)
}
  0x1a   : > { %s1141_s18 = scalar_lea.vmem %s200_s29, 16  ;;  %s1148_s19 = scalar_lea.vmem %s200_s29, 32 }
  0x1b   : > { %p1142_p2 = scmp.ne.s32.totalorder %s200_s29, %s1141_s18  ;;  %p1149_p4 = scmp.lt.s32.totalorder %s200_s29, %s200_s29 }
  0x1c   : > { %p1150_p1 = scmp.lt.s32.totalorder %s1148_s19, %s1141_s18 }
  0x1d   : > { %p1144_p3 = pnand %p1142_p2, %p1130_p10 }
  0x1e   : > { %p1151_p5 = por %p1150_p1, %p1149_p4 }
  0x1f   : > { %p1145_p7 = pneg %p1144_p3 }
  0x21   : > { %p1152_p6 = pnand %p1151_p5, %p1145_p7 }
  0x23   : > { %1155 = shalt.err (!%p1152_p6)
}
  0x24   : > { %1069 = dma.hbm_to_vmem [thread:$0]  (!%p1375_p8), %s1578_s2, 16, %s200_s29, [#allocation6]  }
  0x25   : > { %s1156_s11 = scalar_lea.hbm %s1580_s4, 1024 }
  0x26   : > { %p1157_p9 = scmp.ne.s32.totalorder %s1580_s4, %s1156_s11  ;;  %p1163_p5 = scmp.lt.u32.totalorder %s1156_s11, %s1580_s4 }
  0x28   : > { %p1159_p1 = pnand %p1157_p9, %p1130_p10 }
  0x2a   : > { %p1160_p4 = pneg %p1159_p1 }
  0x2c   : > { %p1165_p6 = pnand %p1163_p5, %p1160_p4 }
  0x2e   : > { %1168 = shalt.err (!%p1165_p6)
}
  0x2f   : > { %s1169_s29 = scalar_lea.vmem %s1379_s7, 1024  ;;  %p1177_p0 = scmp.lt.s32.totalorder %s1379_s7, %s1379_s7 }
  0x30   : > { %p1170_p11 = scmp.ne.s32.totalorder %s1379_s7, %s1169_s29  ;;  %p1178_p2 = scmp.lt.s32.totalorder %s1169_s29, %s1169_s29 }
  0x32   : > { %p1172_p12 = pnand %p1170_p11, %p1130_p10  ;;  %p1179_p3 = por %p1178_p2, %p1177_p0 }
  0x34   : > { %p1173_p13 = pneg %p1172_p12 }
  0x36   : > { %p1180_p7 = pnand %p1179_p3, %p1173_p13 }
  0x38   : > { %1183 = shalt.err (!%p1180_p7)
}
  0x39   : > { %1072 = dma.hbm_to_vmem [thread:$0]  (!%p1375_p8), %s1580_s4, 1024, %s1379_s7, [#allocation9]  }
  0x3a   : > { %p29_p10 = scmp.eq.s32.totalorder %s28_s10, 0  ;;  %s31_s18 = sadd.s32 1, %s1286_s23 }
  0x3b   : > { %p38_p9 = scmp.ne.s32.totalorder %s1286_s23, %s1282_s22  ;;  %p39_p1 = scmp.eq.s32.totalorder %s1290_s24, 0 }
  0x3c   : > { %s1441_s8 = scalar_select %p29_p10, %s1286_s23, %s31_s18  }
  0x3d   : > { %p40_p4 = por %p39_p1, %p38_p9  ;;  %p1082_p5 = scmp.lt.s32.totalorder %s1290_s24, 2 }
  0x3e   : > { %s1445_s19 = sand.u32 1, %s1286_s23   ;;  %s1045_s20 = sshll.u32 %s1290_s24, 7 }
  0x3f   : > { %s1023_s21 = sshll.u32 %s1445_s19, 3  ;;  %s1452_s7 = scalar_lea.hbm %s1576_s0, %s1045_s20 }
  0x40   : > { %s228_s10 = scalar_lea.vmem [#allocation3], %s1023_s21  ;;  %p1454_p8 = pnand %p1082_p5, %p40_p4 }
  0x41   : > { %s236_s11 = sshll.u32 %s228_s10, 4  ;;  %s243_s13 = sand.u32 1, %s1290_s24   ;;  %s1458_s11 = int_to_ptr.vmem [resolvable:$true] %s236_s11 }
  0x42   : > { %s225_s14 = scalar_lea.sflag [#allocation4], %s1445_s19  ;;  %s1184_s15 = scalar_lea.hbm %s1452_s7, 128 }
  0x43   : > { %p1185_p6 = scmp.ne.s32.totalorder %s1452_s7, %s1184_s15  ;;  %p1186_p11 = pneg %p1454_p8 }
  0x44   : > { %s1189_s17 = scalar_lea.hbm %s1576_s0, 256  ;;  %p1190_p0 = scmp.lt.u32.totalorder %s1452_s7, %s1576_s0 }
  0x45   : > { %p1187_p12 = pnand %p1186_p11, %p1185_p6  ;;  %p1191_p2 = scmp.lt.u32.totalorder %s1189_s17, %s1184_s15 }
  0x46   : > { %p1193_p7 = scmp.lt.u32.totalorder %s1184_s15, %s1452_s7 }
  0x47   : > { %p1188_p13 = pneg %p1187_p12  ;;  %p1192_p3 = por %p1191_p2, %p1190_p0 }
  0x49   : > { %p1194_p10 = por %p1193_p7, %p1192_p3 }
  0x4b   : > { %p1195_p9 = pnand %p1194_p10, %p1188_p13 }
  0x4d   : > { %1198 = shalt.err (!%p1195_p9)
}
  0x4e   : > { %s1199_s21 = scalar_lea.vmem %s1458_s11, 128  ;;  %s1294_s28 = smov [#allocation3]  }
  0x4f   : > { %p1200_p1 = scmp.ne.s32.totalorder %s1458_s11, %s1199_s21  ;;  %s1204_s30 = sshll.u32 %s1294_s28, 4  ;;  %s1205_s30 = int_to_ptr.vmem [resolvable:$false] %s1204_s30 }
  0x50   : > { %s1206_s10 = scalar_lea.vmem %s1205_s30, 256  ;;  %p1207_p6 = scmp.lt.s32.totalorder %s1458_s11, %s1205_s30 }
  0x51   : > { %p1202_p4 = pnand %p1200_p1, %p1186_p11  ;;  %p1208_p12 = scmp.lt.s32.totalorder %s1206_s10, %s1199_s21 }
  0x53   : > { %p1203_p5 = pneg %p1202_p4  ;;  %p1209_p0 = por %p1208_p12, %p1207_p6 }
  0x55   : > { %p1210_p2 = pnand %p1209_p0, %p1203_p5 }
  0x57   : > { %1213 = shalt.err (!%p1210_p2)
}
  0x58   : > { %1076 = dma.hbm_to_vmem [thread:$0]  (!%p1454_p8), %s1452_s7, 128, %s1458_s11, %s225_s14  }
  0x59   : > { %s1026_s15 = sshll.u32 %s1445_s19, 5  ;;  %s1046_s29 = sshll.u32 %s1290_s24, 9 }
  0x5a   : > { %s1492_s18 = scalar_lea.hbm %s1577_s1, %s1046_s29  ;;  %s247_s20 = scalar_lea.vmem [#allocation5], %s1026_s15 }
  0x5b   : > { %s255_s21 = sshll.u32 %s247_s20, 4  ;;  %s244_s28 = scalar_lea.sflag [#allocation6], %s243_s13  ;;  %s256_s21 = int_to_ptr.vmem [resolvable:$true] %s255_s21 }
  0x5c   : > { %s1214_s30 = scalar_lea.hbm %s1492_s18, 512  ;;  %s1219_s11 = scalar_lea.hbm %s1577_s1, 1024 }
  0x5d   : > { %p1215_p13 = scmp.ne.s32.totalorder %s1492_s18, %s1214_s30  ;;  %p1220_p10 = scmp.lt.u32.totalorder %s1492_s18, %s1577_s1 }
  0x5e   : > { %p1221_p9 = scmp.lt.u32.totalorder %s1219_s11, %s1214_s30  ;;  %p1223_p4 = scmp.lt.u32.totalorder %s1214_s30, %s1492_s18 }
  0x5f   : > { %p1217_p3 = pnand %p1215_p13, %p1186_p11 }
  0x60   : > { %p1222_p1 = por %p1221_p9, %p1220_p10 }
  0x61   : > { %p1218_p7 = pneg %p1217_p3 }
  0x62   : > { %p1224_p5 = por %p1223_p4, %p1222_p1 }
  0x64   : > { %p1225_p6 = pnand %p1224_p5, %p1218_p7 }
  0x66   : > { %1228 = shalt.err (!%p1225_p6)
}
  0x67   : > { %s1229_s24 = scalar_lea.vmem %s256_s21, 512  ;;  %s1295_s13 = smov [#allocation5]  }
  0x68   : > { %p1230_p12 = scmp.ne.s32.totalorder %s256_s21, %s1229_s24  ;;  %s1234_s15 = sshll.u32 %s1295_s13, 4  ;;  %s1235_s15 = int_to_ptr.vmem [resolvable:$false] %s1234_s15 }
  0x69   : > { %s1236_s29 = scalar_lea.vmem %s1235_s15, 1024  ;;  %p1237_p13 = scmp.lt.s32.totalorder %s256_s21, %s1235_s15 }
  0x6a   : > { %p1232_p0 = pnand %p1230_p12, %p1186_p11  ;;  %p1238_p3 = scmp.lt.s32.totalorder %s1236_s29, %s1229_s24 }
  0x6c   : > { %p1233_p2 = pneg %p1232_p0  ;;  %p1239_p9 = por %p1238_p3, %p1237_p13 }
  0x6e   : > { %p1240_p10 = pnand %p1239_p9, %p1233_p2 }
  0x70   : > { %1243 = shalt.err (!%p1240_p10)
}
  0x71   : > { %1079 = dma.hbm_to_vmem [thread:$0]  (!%p1454_p8), %s1492_s18, 512, %s256_s21, %s244_s28  }
  0x72   : > { %p1590_p7 = scmp.ne.s32.totalorder %s1587_s27, 0 }
  0x73   : > { %s266_s16 = sand.u32 (!%p1590_p7), 1, %s1282_s22   ;;  %p1591_p11 = scmp.ne.s32.totalorder (!%p1590_p7), %s1586_s26, 0 }
  0x74   : > { %264 = sbr.rel (%p1590_p7) target bundleno = 624 (0x270), region = 40  ;;  %s1030_s17 = sshll.u32 (!%p1590_p7), %s266_s16, 3 }
  0x75   : > { %s267_s20 = scalar_lea.sflag (!%p1590_p7), [#allocation4], %s266_s16  ;;  %s270_s30 = scalar_lea.vmem (!%p1590_p7), [#allocation3], %s1030_s17 }
  0x7b   : > { %1261 = dma.done.wait (%p1591_p11), %s267_s20, 128  }
  0x7c   : > { %1263 = vsyncadd (%p1591_p11), %s267_s20, 4294967168  ;;  %s275_s19 = sand.u32 1, %s1354_s25   ;;  %s1031_s12 = sshll.u32 %s266_s16, 5 }
  0x7d   : > { %s276_s7 = scalar_lea.sflag [#allocation6], %s275_s19  ;;  %s279_s18 = scalar_lea.vmem [#allocation5], %s1031_s12 }
  0x7e   : > { %1265 = dma.done.wait (%p1591_p11), %s276_s7, 512  }
  0x7f   : > { %1267 = vsyncadd (%p1591_p11), %s276_s7, 4294966784  ;;  %p1592_p8 = scmp.eq.s32.totalorder %s1354_s25, 0 }
  0x81   : > { %1269 = dma.done.wait (%p1592_p8), [#allocation6], 16   ;;  %p1593_p1 = pmov %p1592_p8 }
  0x83   : > { %1271 = vsyncadd (%p1593_p1), [#allocation6], 4294967280  ;;  %p1594_p4 = pmov %p1593_p1 }
  0x84   : > { %p1595_p5 = pmov %p1593_p1 }
  0x85   : > { %1273 = dma.done.wait (%p1594_p4), [#allocation9], 1024  }
  0x86   : > { %1275 = vsyncadd (%p1595_p5), [#allocation9], 4294966272  ;;  %p1596_p6 = scmp.ne.s32.totalorder %s1354_s25, 0 }
  0x87   : > { %vm322_vm0 = vcmask (!%p1596_p6), 58368   ;;  %v1296_v0 = vmov (!%p1596_p6), 0.0  }
  0x88   : > { %321 = sbr.rel (%p1596_p6) target bundleno = 143 (0x8f), region = 60  ;;  %323 = vst.msk [vmem:[#allocation2] sm:$0x3] (!%p1596_p6), %vm322_vm0, %v1296_v0 }
  0x8f PF: > { %v327_v1 = vld [vmem:[%s279_s18 + $0x8] sm:$0xff]  ;;  %v329_v2 = vld [vmem:[%s279_s18 + $0x18] sm:$0xff]  ;;  %v326_v3 = vld [vmem:[%s279_s18] sm:$0xff]  ;;  %v335_v4 = vlaneseq  ;;  %v1297_v7 = vmov 1983009808   ;;  %vm493_vm1 = vcmask 58368  }
  0x90   : > { %352 = vmatprep.subr.mxu0 %v327_v1  ;;  %422 = vmatprep.subr.mxu1 %v329_v2  ;;  %v328_v5 = vld [vmem:[%s279_s18 + $0x10] sm:$0xff]  ;;  %v333_v8 = vunpack.c.l.s4 %v1297_v7  ;;  %v324_v18 = vld [vmem:[#allocation2] sm:$0x3]  ;;  %p1035_p12 = scmp.ne.s32.totalorder %s1354_s25, 1 }
  0x91   : > { %v325_v6 = vld [vmem:[%s270_s30] sm:$0xff]  ;;  %353 = vmatpush1.xpose.msra.mxu0 %v326_v3  ;;  %423 = vmatpush1.xpose.msra.mxu1 %v328_v5  ;;  %v336_v9 = vshrl.u32 %v335_v4, 7  ;;  %v1298_v26 = vmov (!%p1035_p12), 0.0   ;;  %vm1299_vm2 = vmmov (!%p1035_p12), 0   ;;  %v1036_v27 = vld [vmem:[#allocation7] ss:$0 sm:$0xff] (!%p1035_p12) }
  0x92   : > { %v334_v10 = vunpack.c.0.s8 %v333_v8  ;;  %v331_v11 = vcombine.high %v325_v6, %v325_v6  ;;  %v508_v24 = vld [vmem:[%s1579_s3] sm:$0xff] (!%p1035_p12)  ;;  %1049 = vmatprep.subr.mxu0 (!%p1035_p12), %v1298_v26  ;;  %vm509_vm3 = vcmask (!%p1035_p12), 64512   ;;  %v596_v28 = vld [vmem:[#allocation8 + $0x18] sm:$0xff] (!%p1035_p12)  ;;  %v593_v32 = vld [vmem:[#allocation8] sm:$0xff] (!%p1035_p12)  ;;  %vm591_vm4 = vcmask (!%p1035_p12), 25600  }
  0x93   : > { %v595_v30 = vld [vmem:[#allocation8 + $0x10] sm:$0xff] (!%p1035_p12)  ;;  %v594_v31 = vld [vmem:[#allocation8 + $0x8] sm:$0xff] (!%p1035_p12)  ;;  %v600_v34 = vld [vmem:[#allocation8 + $0x38] sm:$0xff] (!%p1035_p12) }
  0x94   : > { %v1537_v12 = vsub.s32 %v334_v10, %v336_v9  ;;  %601 = vmatprep.subr.mxu1 (!%p1035_p12), %v594_v31  ;;  %v598_v33 = vld [vmem:[#allocation8 + $0x28] sm:$0xff] (!%p1035_p12)  ;;  %v597_v35 = vld [vmem:[#allocation8 + $0x20] sm:$0xff] (!%p1035_p12)  ;;  %v599_v36 = vld [vmem:[#allocation8 + $0x30] sm:$0xff] (!%p1035_p12) }
  0x96   : > { %v338_v13 = vrot.slane %v325_v6, %v1537_v12  ;;  %v345_v14 = vrot.slane %v331_v11, %v1537_v12 }
  0x98   : > { %v346_v15 = vcombine.high %v338_v13, %v338_v13  ;;  %v347_v16 = vcombine.high %v345_v14, %v345_v14 }
  0x9a   : > { %416 = vmatprep.mubr.f32.mxu0 %v346_v15  ;;  %486 = vmatprep.mubr.f32.mxu1 %v347_v16 }
  0x9b   : > { %417 = vmatmul.mubr.f32.vlgmr.msra.gmra.mrb[0].mxu0 %v338_v13  ;;  %487 = vmatmul.mubr.f32.vlgmr.msra.gmra.mrb[0].mxu1 %v345_v14 }
  0x9c   : > { %1051 = vmatprep.mubr.msk.f32.mxu0 (!%p1035_p12), %vm1299_vm2, %v1298_v26  ;;  %1050 = vmatpush3.msra.mxu0 (!%p1035_p12), %v508_v24 }
  0x9d   : > { %665 = vmatprep.mubr.f32.mxu1 (!%p1035_p12), %v1298_v26  ;;  %672 = vmatprep.subr.mxu0 (!%p1035_p12), %v596_v28 }
  0x9e   : > { %602 = vmatpush1.msra.mxu1 (!%p1035_p12), %v593_v32 }
  0x9f   : > { %743 = vmatprep.subr.mxu1 (!%p1035_p12), %v598_v33 }
 0x16d   : > { %498 = sbr.rel (%p1035_p12) target bundleno = 624 (0x270), region = 64 }
 0x16e   : > { %v418_v17 = vpop.f32.mrb[0].mxu0  ;;  %v488_v19 = vpop.f32.mrb[0].mxu1 }
 0x16f   : > { %v489_v20 = vadd.f32 %v488_v19, %v418_v17  ;;  %v420_v21 = vpop.f32.mrb[1].mxu0  ;;  %v490_v22 = vpop.f32.mrb[1].mxu1 }
 0x171   : > { %v492_v23 = vadd.f32 %v489_v20, %v324_v18 }
 0x173   : > { %494 = vst.msk [vmem:[#allocation2] sm:$0x3] %vm493_vm1, %v492_v23 }
 0x17a   : > { %v499_v25 = vld [vmem:[#allocation2] sm:$0x3] }
 0x17b   : > { %v507_v29 = vadd.f32 %v1036_v27, %v499_v25 }
 0x17d   : > { %1052 = vmatmul.mubr.msk.f32.vlgmr.msra.gmra.mrb[0].mxu0 %vm509_vm3, %v507_v29  ;;  %1039 = vmatmul.mubr.msk.f32.vlgmr.msra.gmra.mrb[0].mxu1 %vm509_vm3, %v507_v29 }
 0x17e   : > { %673 = vmatpush1.msra.mxu0 %v595_v30  ;;  %736 = vmatprep.mubr.f32.mxu0 %v1298_v26 }
 0x17f   : > { %814 = vmatprep.subr.mxu0 %v600_v34  ;;  %744 = vmatpush1.msra.mxu1 %v597_v35 }
 0x180   : > { %807 = vmatprep.mubr.f32.mxu1 %v1298_v26 }
 0x181   : > { %1040 = vmatmul.mubr.msk.f32.vlgmr.msra.gmra.mrb[2].mxu0 %vm509_vm3, %v507_v29  ;;  %1041 = vmatmul.mubr.msk.f32.vlgmr.msra.gmra.mrb[2].mxu1 %vm509_vm3, %v507_v29 }
 0x182   : > { %815 = vmatpush1.msra.mxu0 %v599_v36  ;;  %878 = vmatprep.mubr.f32.mxu0 %v1298_v26 }
 0x185   : > { %1042 = vmatmul.mubr.msk.f32.vlgmr.msra.gmra.mrb[4].mxu0 %vm509_vm3, %v507_v29 }
 0x250   : > { %v579_v37 = vpop.f32.mrb[0].mxu0  ;;  %v667_v40 = vpop.f32.mrb[0].mxu1 }
 0x251   : > { %v1038_v38 = vmul.f32 -1.442695, %v579_v37  ;;  %v1053_v39 = vpop.f32.mrb[1].mxu0  ;;  %v669_v41 = vpop.f32.mrb[1].mxu1 }
 0x252   : > { %v893_v43 = vcombine.low %v667_v40, %v669_v41 }
 0x253   : > { %1124 = vpow2.f32 %v1038_v38 }
 0x254   : > { %v738_v42 = vpop.f32.mrb[2].mxu0  ;;  %v901_v45 = vrot.slane %v893_v43, %v1537_v12  ;;  %v809_v47 = vpop.f32.mrb[2].mxu1 }
 0x255   : > { %v740_v44 = vpop.f32.mrb[3].mxu0  ;;  %v811_v48 = vpop.f32.mrb[3].mxu1 }
 0x256   : > { %v894_v46 = vcombine.low %v738_v42, %v740_v44  ;;  %v910_v51 = vcombine.low %v809_v47, %v811_v48 }
 0x258   : > { %v908_v49 = vrot.slane %v894_v46, %v1537_v12  ;;  %v880_v50 = vpop.f32.mrb[4].mxu0  ;;  %v918_v54 = vrot.slane %v910_v51, %v1537_v12 }
 0x259   : > { %v882_v52 = vpop.f32.mrb[5].mxu0 }
 0x25a   : > { %v909_v53 = vcombine.low %v901_v45, %v908_v49  ;;  %v911_v55 = vcombine.low %v880_v50, %v882_v52 }
 0x25c   : > { %929 = vst [vmem:[%s1582_s6] sm:$0xff] %v909_v53  ;;  %v925_v56 = vrot.slane %v911_v55, %v1537_v12 }
 0x25d   : > { %v1125_v57 = vpop.eup %1124 }
 0x25e   : > { %v586_v58 = vadd.f32 1.0, %v1125_v57  ;;  %v926_v59 = vcombine.low %v918_v54, %v925_v56 }
 0x260   : > { %1126 = vrcp.f32 %v586_v58  ;;  %930 = vst [vmem:[%s1582_s6 + $0x8] sm:$0xff] %v926_v59 }
 0x26a   : > { %v1127_v60 = vpop.eup %1126 }
 0x26b   : > { %v589_v61 = vmul.f32 0.01, %v1127_v60 }
 0x26d   : > { %v590_v62 = vadd.f32 0.006666667, %v589_v61 }
 0x26f   : > { %592 = vst.msk [vmem:[%s1581_s5] sm:$0x3] %vm591_vm4, %v590_v62 }
 0x270 PF: > { %p21_p0 = scmp.ge.s32.totalorder %s1382_s9, 4   ;;  %s1597_s21 = smov %s1282_s22 }
 0x271   : > { %s1598_s22 = smov %s1286_s23  ;;  %s1599_s23 = smov %s1441_s8 }
 0x272   : > { %s1600_s24 = smov %s1382_s9  ;;  %23 = sbr.rel (!%p21_p0) target bundleno = 6 (0x6), region = 113 }
 0x279   :  { %948 = vsyncpa [#allocation4], 1 }
 0x27a   :  { %950 = vsyncpa [#allocation4 + $0x1], 1 }
 0x27b   :  { %951 = vsyncpa [#allocation6], 1 }
 0x27c   :  { %953 = vsyncpa [#allocation6 + $0x1], 1 }
 0x27d   :  { %954 = vsyncpa [#allocation9], 1 }

// kernel: nrbs_forward.3
= control target key start
LH: loop header
LB: loop body
LE: loop exit
PB: predicated region body
PF: predicated region fallthrough
CT: control target
= control target key end

     0   :  { %9 = vsyncpa [#allocation4], 0  ;;  %s1279_s0 = inlined_call_operand.vmem [shape: f32[2,4], index: 0, kind: input, shape index: {}]   ;;  %s1280_s1 = inlined_call_operand.vmem [shape: s32[1,1024], index: 1, kind: input, shape index: {}]   ;;  %s1281_s2 = inlined_call_operand.vmem [shape: f32[8,1024], index: 2, kind: input, shape index: {}]   ;;  %s1282_s3 = inlined_call_operand.vmem [shape: f32[2,8,1024], index: 3, kind: input, shape index: {}]   ;;  %s1283_s4 = inlined_call_operand.hbm [shape: f32[2,1024], index: 4, kind: output, shape index: {}]  }
   0x1   :  { %11 = vsyncpa [#allocation4 + $0x1], 0  ;;  %s1019_s15 = smov 0   ;;  %s1021_s16 = smov 0  }
   0x2   :  { %s1023_s17 = smov 0   ;;  %s1025_s18 = smov 0  }
   0x3 LB: > { %s1040_s19 = sadd.s32 4294967295, %s985_s18   ;;  %s830_s20 = sadd.s32 4294967294, %s985_s18   ;;  %s985_s18 = sphi %s1025_s18, %s1321_s18   ;;  %s981_s17 = sphi %s1023_s17, %s1320_s17   ;;  %s977_s16 = sphi %s1021_s16, %s1319_s16   ;;  %s973_s15 = sphi %s1019_s15, %s1318_s15  }
   0x4   : > { %s1044_s21 = sadd.s32 1, %s985_s18   ;;  %s97_s22 = sadd.s32 1, %s981_s17 }
   0x5   : > { %s94_s23 = ssub.s32 %s985_s18, %s1044_s21  ;;  %p104_p0 = scmp.ne.s32.totalorder %s981_s17, %s977_s16 }
   0x6   : > { %p95_p1 = scmp.eq.s32.totalorder %s94_s23, 0  ;;  %p105_p2 = scmp.eq.s32.totalorder %s985_s18, 0 }
   0x7   : > { %p134_p3 = scmp.eq.s32.totalorder %s1040_s19, 1  ;;  %p139_p4 = scmp.ne.s32.totalorder %s977_s16, %s973_s15 }
   0x8   : > { %s1056_s24 = scalar_select %p95_p1, %s981_s17, %s97_s22  }
   0x9   : > { %p106_p5 = por %p105_p2, %p104_p0  ;;  %p1058_p6 = por %p134_p3, %p104_p0 }
   0xa   : > { %p140_p7 = scmp.eq.s32.totalorder %s830_s20, 1  ;;  %p832_p9 = scmp.ge.s32.totalorder %s985_s18, 2 }
   0xc   : > { %p1062_p8 = por %p140_p7, %p139_p4  ;;  %159 = sbr.rel (%p832_p9) target bundleno = 27 (0x1b), region = 20 }
  0x13   : > { %179 = sbr.rel (!%p106_p5) target bundleno = 27 (0x1b), region = 32  ;;  %s181_s27 = sand.u32 (%p106_p5), 1, %s981_s17  }
  0x14   : > { %s847_s28 = sshll.u32 (%p106_p5), %s985_s18, 5  ;;  %s833_s29 = sshll.u32 (%p106_p5), %s181_s27, 6 }
  0x15   : > { %s186_s6 = scalar_lea.vmem (%p106_p5), %s1282_s3, %s847_s28  ;;  %s183_s7 = scalar_lea.vmem (%p106_p5), [#allocation2], %s833_s29 }
  0x16   : > { %v199_v0 = vld [vmem:[%s186_s6] sm:$0xff] (%p106_p5)  ;;  %v201_v1 = vld [vmem:[%s186_s6 + $0x8] sm:$0xff] (%p106_p5)  ;;  %v203_v2 = vld [vmem:[%s186_s6 + $0x10] sm:$0xff] (%p106_p5) }
  0x17   : > { %200 = vst [vmem:[%s183_s7] sm:$0xff] (%p106_p5), %v199_v0  ;;  %202 = vst [vmem:[%s183_s7 + $0x8] sm:$0xff] (%p106_p5), %v201_v1  ;;  %v205_v3 = vld [vmem:[%s186_s6 + $0x18] sm:$0xff] (%p106_p5)  ;;  %v207_v4 = vld [vmem:[%s186_s6 + $0x40] sm:$0xff] (%p106_p5) }
  0x18   : > { %204 = vst [vmem:[%s183_s7 + $0x10] sm:$0xff] (%p106_p5), %v203_v2  ;;  %v209_v5 = vld [vmem:[%s186_s6 + $0x48] sm:$0xff] (%p106_p5)  ;;  %206 = vst [vmem:[%s183_s7 + $0x18] sm:$0xff] (%p106_p5), %v205_v3  ;;  %v211_v6 = vld [vmem:[%s186_s6 + $0x50] sm:$0xff] (%p106_p5) }
  0x19   : > { %208 = vst [vmem:[%s183_s7 + $0x20] sm:$0xff] (%p106_p5), %v207_v4  ;;  %210 = vst [vmem:[%s183_s7 + $0x28] sm:$0xff] (%p106_p5), %v209_v5  ;;  %v213_v7 = vld [vmem:[%s186_s6 + $0x58] sm:$0xff] (%p106_p5) }
  0x1a   : > { %212 = vst [vmem:[%s183_s7 + $0x30] sm:$0xff] %v211_v6  ;;  %214 = vst [vmem:[%s183_s7 + $0x38] sm:$0xff] %v213_v7 }
  0x1b PF: > { %p836_p10 = scmp.ge.s32.totalorder %s985_s18, 1  ;;  %p219_p11 = scmp.lt.s32.totalorder %s985_s18, 3 }
  0x1d   : > { %p220_p12 = pnand %p836_p10, %p219_p11 }
  0x1e   : > { %v274_v8 = vld [vmem:[%s1279_s0] sm:$0x3] (!%p220_p12)  ;;  %v987_v9 = vmov (!%p220_p12), 0   ;;  %v988_v10 = vmov (!%p220_p12), 2   ;;  %v989_v11 = vmov (!%p220_p12), 1   ;;  %v990_v12 = vmov (!%p220_p12), 3  }
  0x1f   : > { %223 = sbr.rel (%p220_p12) target bundleno = 274 (0x112), region = 55  ;;  %894 = vset.pattern.permute.xlu0 (!%p220_p12), %v987_v9  ;;  %896 = vset.pattern.permute.xlu1 (!%p220_p12), %v988_v10  ;;  %s839_s10 = sshll.u32 (!%p220_p12), %s1040_s19, 2  ;;  %v277_v13 = vlaneseq (!%p220_p12) }
  0x20   : > { %299 = vperm.xlu0 (!%p220_p12), %894, %v274_v8   ;;  %359 = vperm.xlu1 (!%p220_p12), %896, %v274_v8   ;;  %p261_p13 = scmp.lt.s32.totalorder (!%p220_p12), %s839_s10, 7  ;;  %s1226_s27 = sand.u32 (!%p220_p12), 1, %s977_s16  }
  0x21   : > { %v1086_v15 = vshrl.u32 (!%p220_p12), %v277_v13, 7  ;;  %s837_s28 = sshll.u32 (!%p220_p12), %s1226_s27, 6  ;;  %s838_s30 = sshll.u32 (!%p220_p12), %s1226_s27, 3 }
  0x22   : > { %s228_s29 = scalar_lea.vmem (!%p220_p12), [#allocation2], %s837_s28  ;;  %s848_s5 = sshll.u32 (!%p220_p12), %s1040_s19, 7 }
  0x23   : > { %v1089_v16 = vsub.s32 (!%p220_p12), 0, %v1086_v15  ;;  %v1092_v17 = vsub.s32 (!%p220_p12), 1, %v1086_v15  ;;  %v1095_v18 = vsub.s32 (!%p220_p12), 2, %v1086_v15  ;;  %v1098_v19 = vsub.s32 (!%p220_p12), 3, %v1086_v15  ;;  %s259_s6 = scalar_lea.vmem (!%p220_p12), [#allocation3], %s838_s30  ;;  %s730_s11 = scalar_lea.sflag (!%p220_p12), [#allocation4], %s1226_s27 }
  0x24   : > { %895 = vset.pattern.permute.xlu0 (!%p220_p12), %v989_v11  ;;  %897 = vset.pattern.permute.xlu1 (!%p220_p12), %v990_v12  ;;  %s744_s7 = sshll.u32 (!%p220_p12), %s259_s6, 4  ;;  %s993_s12 = smov (!%p220_p12), [#allocation3]   ;;  %s1237_s7 = int_to_ptr.vmem [resolvable:$true] %s744_s7 }
  0x25   : > { %329 = vperm.xlu0 (!%p220_p12), %895, %v274_v8   ;;  %389 = vperm.xlu1 (!%p220_p12), %897, %v274_v8   ;;  %s923_s19 = scalar_lea.vmem (!%p220_p12), %s1237_s7, 128 }
  0x26   : > { %s1323_s10 = smov (!%p261_p13, %s839_s10), 7  ;;  %p924_p0 = scmp.ne.s32.totalorder %s1237_s7, %s923_s19 }
  0x27   : > { %s263_s13 = scalar_lea.vmem %s1280_s1, %s1323_s10  ;;  %s841_s14 = sshll.u32 %s1323_s10, 3 }
  0x28   : > { %v273_v14 = vld [vmem:[%s263_s13] sm:$0xf]  ;;  %s269_s23 = scalar_lea.vmem %s1281_s2, %s841_s14  ;;  %s1235_s10 = scalar_lea.hbm %s1283_s4, %s848_s5 }
  0x29   : > { %898 = vset.pattern.permute.xlu0 %v990_v12  ;;  %vm275_vm0 = vcmp.eq.s32.totalorder %v273_v14, 0  ;;  %vm306_vm1 = vcmp.eq.s32.totalorder %v273_v14, 1  ;;  %vm336_vm2 = vcmp.eq.s32.totalorder %v273_v14, 2  ;;  %vm366_vm3 = vcmp.eq.s32.totalorder %v273_v14, 3  ;;  %v416_v49 = vld [vmem:[%s269_s23] sm:$0xff]  ;;  %v417_v54 = vld [vmem:[%s269_s23 + $0x8] sm:$0xff]  ;;  %p925_p1 = pnand %p924_p0, %p1058_p6 }
  0x2a   : > { %v276_v20 = vsel %vm275_vm0, 1, %v987_v9  ;;  %v307_v21 = vsel %vm306_vm1, 1, %v987_v9  ;;  %v337_v22 = vsel %vm336_vm2, 1, %v987_v9  ;;  %v367_v27 = vsel %vm366_vm3, 1, %v987_v9  ;;  %v418_v55 = vld [vmem:[%s269_s23 + $0x10] sm:$0xff]  ;;  %v419_v56 = vld [vmem:[%s269_s23 + $0x18] sm:$0xff] }
  0x2b   : > { %v280_v23 = vrot.slane %v276_v20, %v1089_v16  ;;  %v284_v24 = vrot.slane %v276_v20, %v1092_v17  ;;  %v288_v25 = vrot.slane %v276_v20, %v1095_v18  ;;  %v292_v26 = vrot.slane %v276_v20, %v1098_v19  ;;  %p926_p2 = pneg %p925_p1  ;;  %s927_s13 = sshll.u32 %s993_s12, 4  ;;  %s928_s13 = int_to_ptr.vmem [resolvable:$false] %s927_s13 }
  0x2c   : > { %v311_v28 = vrot.slane %v307_v21, %v1089_v16  ;;  %v315_v29 = vrot.slane %v307_v21, %v1092_v17  ;;  %v319_v30 = vrot.slane %v307_v21, %v1095_v18  ;;  %v323_v31 = vrot.slane %v307_v21, %v1098_v19  ;;  %s929_s14 = scalar_lea.vmem %s928_s13, 256  ;;  %p930_p3 = scmp.lt.s32.totalorder %s1237_s7, %s928_s13 }
  0x2d   : > { %v341_v32 = vrot.slane %v337_v22, %v1089_v16  ;;  %v345_v33 = vrot.slane %v337_v22, %v1092_v17  ;;  %v349_v34 = vrot.slane %v337_v22, %v1095_v18  ;;  %v353_v35 = vrot.slane %v337_v22, %v1098_v19  ;;  %p931_p4 = scmp.lt.s32.totalorder %s929_s14, %s923_s19 }
  0x2e   : > { %v371_v38 = vrot.slane %v367_v27, %v1089_v16  ;;  %v375_v39 = vrot.slane %v367_v27, %v1092_v17  ;;  %v379_v40 = vrot.slane %v367_v27, %v1095_v18  ;;  %v383_v41 = vrot.slane %v367_v27, %v1098_v19 }
  0x2f   : > { %vm1116_vm4 = vcmp.eq.s32.totalorder %v280_v23, 1  ;;  %vm1120_vm5 = vcmp.eq.s32.totalorder %v284_v24, 1  ;;  %vm1124_vm6 = vcmp.eq.s32.totalorder %v288_v25, 1  ;;  %vm1128_vm7 = vcmp.eq.s32.totalorder %v292_v26, 1  ;;  %p932_p5 = por %p931_p4, %p930_p3 }
  0x30   : > { %vm1132_vm8 = vcmp.eq.s32.totalorder %v311_v28, 1  ;;  %vm1136_vm9 = vcmp.eq.s32.totalorder %v315_v29, 1  ;;  %vm1140_vm10 = vcmp.eq.s32.totalorder %v319_v30, 1  ;;  %vm1144_vm11 = vcmp.eq.s32.totalorder %v323_v31, 1 }
  0x31   : > { %vm1148_vm12 = vcmp.eq.s32.totalorder %v341_v32, 1  ;;  %vm1152_vm13 = vcmp.eq.s32.totalorder %v345_v33, 1  ;;  %vm1156_vm14 = vcmp.eq.s32.totalorder %v349_v34, 1  ;;  %vm1160_vm15 = vcmp.eq.s32.totalorder %v353_v35, 1  ;;  %p933_p7 = pnand %p932_p5, %p926_p2 }
  0x32   : > { %vm1164_vm0 = vcmp.eq.s32.totalorder %v371_v38, 1  ;;  %vm1168_vm1 = vcmp.eq.s32.totalorder %v375_v39, 1  ;;  %vm1172_vm2 = vcmp.eq.s32.totalorder %v379_v40, 1  ;;  %vm1176_vm3 = vcmp.eq.s32.totalorder %v383_v41, 1 }
  0x33   : > { %v991_v21 = vmov 1966171168  }
  0x34   : > { %v427_v22 = vunpack.c.l.s4 %v991_v21  ;;  %v523_v21 = vld [vmem:[%s228_s29 + $0x18] sm:$0xff] }
  0x36   : > { %v428_v27 = vunpack.c.0.s8 %v427_v22 }
  0x9f   : > { %v300_v36 = vpop.permute.xlu0 %299  ;;  %v360_v37 = vpop.permute.xlu1 %359 }
  0xa0   : > { %v302_v59 = vsel %vm1116_vm4, %v300_v36, 0.0  ;;  %v303_v60 = vsel %vm1120_vm5, %v300_v36, 0.0  ;;  %v304_v61 = vsel %vm1124_vm6, %v300_v36, 0.0  ;;  %v305_v62 = vsel %vm1128_vm7, %v300_v36, 0.0 }
  0xa1   : > { %v431_v36 = vsub.s32 %v428_v27, %v1086_v15  ;;  %v525_v27 = vld [vmem:[%s228_s29 + $0x28] sm:$0xff]  ;;  %vm719_vm4 = vcmask 1041409   ;;  %vm721_vm5 = vcmask 1043459   ;;  %vm723_vm6 = vcmask 1045509  }
  0xa2   : > { %vm725_vm7 = vcmask 1047559  }
  0xa4   : > { %v330_v58 = vpop.permute.xlu0 %329  ;;  %v390_v63 = vpop.permute.xlu1 %389 }
  0xa5   : > { %v332_v0 = vsel %vm1132_vm8, %v330_v58, %v302_v59  ;;  %v333_v1 = vsel %vm1136_vm9, %v330_v58, %v303_v60  ;;  %v334_v2 = vsel %vm1140_vm10, %v330_v58, %v304_v61  ;;  %v335_v3 = vsel %vm1144_vm11, %v330_v58, %v305_v62 }
  0xa6   : > { %v362_v4 = vsel %vm1148_vm12, %v360_v37, %v332_v0  ;;  %v363_v5 = vsel %vm1152_vm13, %v360_v37, %v333_v1  ;;  %v364_v6 = vsel %vm1156_vm14, %v360_v37, %v334_v2  ;;  %v365_v7 = vsel %vm1160_vm15, %v360_v37, %v335_v3 }
  0xa7   : > { %v392_v8 = vsel %vm1164_vm0, %v390_v63, %v362_v4  ;;  %v393_v9 = vsel %vm1168_vm1, %v390_v63, %v363_v5  ;;  %v394_v10 = vsel %vm1172_vm2, %v390_v63, %v364_v6  ;;  %v395_v11 = vsel %vm1176_vm3, %v390_v63, %v365_v7 }
  0xa8   : > { %v396_v12 = vmul.f32 %v392_v8, %v392_v8  ;;  %v397_v13 = vmul.f32 %v393_v9, %v393_v9  ;;  %v398_v14 = vmul.f32 %v394_v10, %v394_v10  ;;  %v399_v20 = vmul.f32 %v395_v11, %v395_v11 }
  0xaa   : > { %899 = vrcp.f32 %v396_v12 }
  0xab   : > { %901 = vrcp.f32 %v397_v13 }
  0xac   : > { %903 = vrcp.f32 %v398_v14 }
  0xad   : > { %905 = vrcp.f32 %v399_v20 }
  0xb4   : > { %v900_v23 = vpop.eup %899 }
  0xb5   : > { %v902_v24 = vpop.eup %901  ;;  %v404_v25 = vmul.f32 %v900_v23, %v396_v12 }
  0xb6   : > { %v904_v26 = vpop.eup %903  ;;  %v405_v28 = vmul.f32 %v902_v24, %v397_v13  ;;  %v520_v13 = vld [vmem:[%s228_s29] sm:$0xff] }
  0xb7   : > { %v906_v29 = vpop.eup %905  ;;  %v406_v30 = vmul.f32 %v904_v26, %v398_v14  ;;  %v408_v31 = vsub.f32 2.0, %v404_v25  ;;  %v521_v14 = vld [vmem:[%s228_s29 + $0x8] sm:$0xff] }
  0xb8   : > { %v407_v32 = vmul.f32 %v906_v29, %v399_v20  ;;  %v409_v33 = vsub.f32 2.0, %v405_v28  ;;  %v522_v20 = vld [vmem:[%s228_s29 + $0x10] sm:$0xff] }
  0xb9   : > { %v410_v34 = vsub.f32 2.0, %v406_v30  ;;  %v412_v35 = vmul.f32 %v900_v23, %v408_v31 }
  0xba   : > { %v411_v37 = vsub.f32 2.0, %v407_v32  ;;  %v413_v38 = vmul.f32 %v902_v24, %v409_v33  ;;  %v526_v32 = vld [vmem:[%s228_s29 + $0x30] sm:$0xff]  ;;  %v527_v33 = vld [vmem:[%s228_s29 + $0x38] sm:$0xff] }
  0xbb   : > { %v414_v39 = vmul.f32 %v904_v26, %v410_v34  ;;  %v524_v26 = vld [vmem:[%s228_s29 + $0x20] sm:$0xff] }
  0xbc   : > { %v415_v40 = vmul.f32 %v906_v29, %v411_v37  ;;  %v424_v41 = vcombine.low %v412_v35, %v413_v38 }
  0xbe   : > { %v425_v42 = vcombine.low %v414_v39, %v415_v40  ;;  %v432_v43 = vrot.slane %v424_v41, %v431_v36 }
  0xc0   : > { %v439_v44 = vrot.slane %v425_v42, %v431_v36 }
  0xc2   : > { %v440_v45 = vcombine.low %v432_v43, %v439_v44  ;;  %v441_v46 = vcombine.high %v432_v43, %v439_v44 }
  0xc4   : > { %v448_v47 = vrot.slane %v440_v45, %v431_v36  ;;  %v455_v48 = vrot.slane %v441_v46, %v431_v36 }
  0xc6   : > { %v459_v50 = vrot.slane %v448_v47, %v1089_v16  ;;  %v463_v51 = vrot.slane %v448_v47, %v1092_v17  ;;  %v467_v52 = vrot.slane %v448_v47, %v1095_v18  ;;  %v471_v53 = vrot.slane %v448_v47, %v1098_v19 }
  0xc7   : > { %v475_v57 = vrot.slane %v455_v48, %v1089_v16  ;;  %v479_v58 = vrot.slane %v455_v48, %v1092_v17  ;;  %v483_v59 = vrot.slane %v455_v48, %v1095_v18  ;;  %v487_v60 = vrot.slane %v455_v48, %v1098_v19 }
  0xc8   : > { %v496_v61 = vmul.f32 %v459_v50, %v416_v49  ;;  %v497_v62 = vmul.f32 %v463_v51, %v417_v54  ;;  %v498_v63 = vmul.f32 %v467_v52, %v418_v55  ;;  %v499_v0 = vmul.f32 %v471_v53, %v419_v56 }
  0xc9   : > { %v500_v1 = vmul.f32 %v475_v57, %v416_v49  ;;  %v501_v2 = vmul.f32 %v479_v58, %v417_v54  ;;  %v502_v3 = vmul.f32 %v483_v59, %v418_v55  ;;  %v503_v4 = vmul.f32 %v487_v60, %v419_v56 }
  0xca   : > { %v504_v5 = vsub.f32 1.0, %v496_v61  ;;  %v505_v16 = vsub.f32 1.0, %v497_v62  ;;  %v506_v6 = vsub.f32 1.0, %v498_v63  ;;  %v507_v17 = vsub.f32 1.0, %v499_v0 }
  0xcb   : > { %v508_v7 = vsub.f32 1.0, %v500_v1  ;;  %v509_v18 = vsub.f32 1.0, %v501_v2  ;;  %v510_v8 = vsub.f32 1.0, %v502_v3  ;;  %v511_v19 = vsub.f32 1.0, %v503_v4 }
  0xcc   : > { %v512_v9 = vmax.f32 %v504_v5, 0.0  ;;  %v513_v10 = vmax.f32 %v505_v16, 0.0  ;;  %v514_v11 = vmax.f32 %v506_v6, 0.0  ;;  %v515_v12 = vmax.f32 %v507_v17, 0.0 }
  0xcd   : > { %v516_v22 = vmax.f32 %v508_v7, 0.0  ;;  %v517_v23 = vmax.f32 %v509_v18, 0.0  ;;  %v518_v24 = vmax.f32 %v510_v8, 0.0  ;;  %v519_v25 = vmax.f32 %v511_v19, 0.0 }
  0xce   : > { %v584_v28 = vrot.slane %v512_v9, 4  ;;  %v590_v29 = vrot.slane %v513_v10, 4  ;;  %v596_v30 = vrot.slane %v514_v11, 4  ;;  %v602_v31 = vrot.slane %v515_v12, 4 }
  0xcf   : > { %v528_v34 = vmul.f32 %v520_v13, %v512_v9  ;;  %v529_v35 = vmul.f32 %v521_v14, %v513_v10  ;;  %v530_v36 = vmul.f32 %v522_v20, %v514_v11  ;;  %v531_v37 = vmul.f32 %v523_v21, %v515_v12 }
  0xd0   : > { %v532_v38 = vmul.f32 %v524_v26, %v516_v22  ;;  %v533_v39 = vmul.f32 %v525_v27, %v517_v23  ;;  %v534_v40 = vmul.f32 %v526_v32, %v518_v24  ;;  %v535_v41 = vmul.f32 %v527_v33, %v519_v25 }
  0xd1   : > { %v585_v42 = vadd.f32 %v584_v28, %v512_v9  ;;  %v591_v43 = vadd.f32 %v590_v29, %v513_v10  ;;  %v597_v44 = vadd.f32 %v596_v30, %v514_v11  ;;  %v603_v45 = vadd.f32 %v602_v31, %v515_v12 }
  0xd2   : > { %v536_v46 = vrot.slane %v528_v34, 4  ;;  %v542_v47 = vrot.slane %v529_v35, 4  ;;  %v548_v48 = vrot.slane %v530_v36, 4  ;;  %v554_v49 = vrot.slane %v531_v37, 4 }
  0xd3   : > { %v560_v50 = vrot.slane %v532_v38, 4  ;;  %v566_v51 = vrot.slane %v533_v39, 4  ;;  %v572_v52 = vrot.slane %v534_v40, 4  ;;  %v578_v53 = vrot.slane %v535_v41, 4 }
  0xd4   : > { %v586_v54 = vrot.slane %v585_v42, 2  ;;  %v592_v55 = vrot.slane %v591_v43, 2  ;;  %v598_v56 = vrot.slane %v597_v44, 2  ;;  %v604_v57 = vrot.slane %v603_v45, 2 }
  0xd5   : > { %v608_v58 = vrot.slane %v516_v22, 4  ;;  %v614_v59 = vrot.slane %v517_v23, 4  ;;  %v620_v60 = vrot.slane %v518_v24, 4  ;;  %v626_v61 = vrot.slane %v519_v25, 4 }
  0xd6   : > { %v587_v62 = vadd.f32 %v586_v54, %v585_v42  ;;  %v593_v63 = vadd.f32 %v592_v55, %v591_v43  ;;  %v599_v0 = vadd.f32 %v598_v56, %v597_v44  ;;  %v605_v1 = vadd.f32 %v604_v57, %v603_v45 }
  0xd7   : > { %v609_v2 = vadd.f32 %v608_v58, %v516_v22  ;;  %v615_v3 = vadd.f32 %v614_v59, %v517_v23  ;;  %v621_v4 = vadd.f32 %v620_v60, %v518_v24  ;;  %v627_v5 = vadd.f32 %v626_v61, %v519_v25 }
  0xd8   : > { %v588_v16 = vrot.slane %v587_v62, 1  ;;  %v594_v6 = vrot.slane %v593_v63, 1  ;;  %v600_v17 = vrot.slane %v599_v0, 1  ;;  %v606_v7 = vrot.slane %v605_v1, 1 }
  0xd9   : > { %v610_v18 = vrot.slane %v609_v2, 2  ;;  %v616_v8 = vrot.slane %v615_v3, 2  ;;  %v622_v19 = vrot.slane %v621_v4, 2  ;;  %v628_v9 = vrot.slane %v627_v5, 2 }
  0xda   : > { %v537_v10 = vadd.f32 %v536_v46, %v528_v34  ;;  %v543_v11 = vadd.f32 %v542_v47, %v529_v35  ;;  %v589_v12 = vadd.f32 %v588_v16, %v587_v62  ;;  %v595_v13 = vadd.f32 %v594_v6, %v593_v63 }
  0xdb   : > { %v611_v14 = vadd.f32 %v610_v18, %v609_v2  ;;  %v617_v20 = vadd.f32 %v616_v8, %v615_v3  ;;  %v623_v21 = vadd.f32 %v622_v19, %v621_v4  ;;  %v629_v26 = vadd.f32 %v628_v9, %v627_v5 }
  0xdc   : > { %v549_v22 = vadd.f32 %v548_v48, %v530_v36  ;;  %v601_v23 = vadd.f32 %v600_v17, %v599_v0  ;;  %v607_v24 = vadd.f32 %v606_v7, %v605_v1  ;;  %907 = vrcp.f32 %v589_v12 }
  0xdd   : > { %v612_v25 = vrot.slane %v611_v14, 1  ;;  %v618_v27 = vrot.slane %v617_v20, 1  ;;  %v624_v28 = vrot.slane %v623_v21, 1  ;;  %v630_v29 = vrot.slane %v629_v26, 1 }
  0xde   : > { %v555_v30 = vadd.f32 %v554_v49, %v531_v37  ;;  %v561_v31 = vadd.f32 %v560_v50, %v532_v38  ;;  %v567_v32 = vadd.f32 %v566_v51, %v533_v39  ;;  %909 = vrcp.f32 %v595_v13 }
  0xdf   : > { %v573_v33 = vadd.f32 %v572_v52, %v534_v40  ;;  %v579_v34 = vadd.f32 %v578_v53, %v535_v41  ;;  %v613_v35 = vadd.f32 %v612_v25, %v611_v14  ;;  %v619_v42 = vadd.f32 %v618_v27, %v617_v20 }
  0xe0   : > { %v538_v43 = vrot.slane %v537_v10, 2  ;;  %v544_v44 = vrot.slane %v543_v11, 2  ;;  %v625_v45 = vadd.f32 %v624_v28, %v623_v21  ;;  %911 = vrcp.f32 %v601_v23 }
  0xe1   : > { %v631_v36 = vadd.f32 %v630_v29, %v629_v26  ;;  %913 = vrcp.f32 %v607_v24  ;;  %v550_v46 = vrot.slane %v549_v22, 2  ;;  %v556_v47 = vrot.slane %v555_v30, 2 }
  0xe2   : > { %v562_v48 = vrot.slane %v561_v31, 2  ;;  %915 = vrcp.f32 %v613_v35  ;;  %v568_v54 = vrot.slane %v567_v32, 2  ;;  %v574_v55 = vrot.slane %v573_v33, 2 }
  0xe3   : > { %917 = vrcp.f32 %v619_v42  ;;  %v539_v37 = vadd.f32 %v538_v43, %v537_v10  ;;  %v545_v38 = vadd.f32 %v544_v44, %v543_v11  ;;  %v580_v39 = vrot.slane %v579_v34, 2 }
  0xe4   : > { %919 = vrcp.f32 %v625_v45  ;;  %v551_v41 = vadd.f32 %v550_v46, %v549_v22  ;;  %v557_v49 = vadd.f32 %v556_v47, %v555_v30  ;;  %v563_v50 = vadd.f32 %v562_v48, %v561_v31 }
  0xe5   : > { %921 = vrcp.f32 %v631_v36  ;;  %v992_v51 = vmov 1983009808   ;;  %v569_v53 = vadd.f32 %v568_v54, %v567_v32  ;;  %v575_v56 = vadd.f32 %v574_v55, %v573_v33 }
  0xe6   : > { %v908_v40 = vpop.eup %907  ;;  %v683_v52 = vunpack.c.l.s4 %v992_v51  ;;  %v540_v59 = vrot.slane %v539_v37, 1  ;;  %v546_v60 = vrot.slane %v545_v38, 1  ;;  %v581_v61 = vadd.f32 %v580_v39, %v579_v34 }
  0xe7   : > { %v640_v57 = vmul.f32 %v908_v40, %v589_v12  ;;  %v552_v1 = vrot.slane %v551_v41, 1  ;;  %v558_v2 = vrot.slane %v557_v49, 1  ;;  %v564_v3 = vrot.slane %v563_v50, 1 }
  0xe8   : > { %v910_v58 = vpop.eup %909  ;;  %v684_v4 = vunpack.c.0.s8 %v683_v52  ;;  %v570_v16 = vrot.slane %v569_v53, 1  ;;  %v576_v6 = vrot.slane %v575_v56, 1  ;;  %v541_v8 = vadd.f32 %v540_v59, %v539_v37 }
  0xe9   : > { %v641_v62 = vmul.f32 %v910_v58, %v595_v13  ;;  %v648_v63 = vsub.f32 2.0, %v640_v57  ;;  %v547_v19 = vadd.f32 %v546_v60, %v545_v38  ;;  %v582_v9 = vrot.slane %v581_v61, 1 }
  0xea   : > { %v912_v0 = vpop.eup %911  ;;  %v553_v26 = vadd.f32 %v552_v1, %v551_v41  ;;  %v559_v22 = vadd.f32 %v558_v2, %v557_v49  ;;  %v565_v29 = vadd.f32 %v564_v3, %v563_v50  ;;  %v571_v32 = vadd.f32 %v570_v16, %v569_v53 }
  0xeb   : > { %v914_v5 = vpop.eup %913  ;;  %v642_v17 = vmul.f32 %v912_v0, %v601_v23  ;;  %v649_v7 = vsub.f32 2.0, %v641_v62  ;;  %v656_v13 = vmul.f32 %v908_v40, %v648_v63  ;;  %v583_v39 = vadd.f32 %v582_v9, %v581_v61 }
  0xec   : > { %v916_v18 = vpop.eup %915  ;;  %v643_v10 = vmul.f32 %v914_v5, %v607_v24  ;;  %v687_v41 = vsub.s32 %v684_v4, %v1086_v15 }
  0xed   : > { %v918_v11 = vpop.eup %917  ;;  %v644_v12 = vmul.f32 %v916_v18, %v613_v35  ;;  %v650_v14 = vsub.f32 2.0, %v642_v17  ;;  %v657_v20 = vmul.f32 %v910_v58, %v649_v7  ;;  %v664_v35 = vmul.f32 %v656_v13, %v541_v8 }
  0xee   : > { %v920_v21 = vpop.eup %919  ;;  %v645_v25 = vmul.f32 %v918_v11, %v619_v42  ;;  %v651_v27 = vsub.f32 2.0, %v643_v10  ;;  %v577_v42 = vadd.f32 %v576_v6, %v575_v56 }
  0xef   : > { %v922_v28 = vpop.eup %921  ;;  %v646_v30 = vmul.f32 %v920_v21, %v625_v45  ;;  %v652_v23 = vsub.f32 2.0, %v644_v12  ;;  %v658_v31 = vmul.f32 %v912_v0, %v650_v14  ;;  %v665_v46 = vmul.f32 %v657_v20, %v547_v19 }
  0xf0   : > { %v647_v33 = vmul.f32 %v922_v28, %v631_v36  ;;  %v653_v34 = vsub.f32 2.0, %v645_v25  ;;  %v659_v43 = vmul.f32 %v914_v5, %v651_v27 }
  0xf1   : > { %v654_v24 = vsub.f32 2.0, %v646_v30  ;;  %v660_v44 = vmul.f32 %v916_v18, %v652_v23  ;;  %v666_v54 = vmul.f32 %v658_v31, %v553_v26  ;;  %v680_v50 = vcombine.low %v664_v35, %v665_v46 }
  0xf2   : > { %v655_v47 = vsub.f32 2.0, %v647_v33  ;;  %v661_v48 = vmul.f32 %v918_v11, %v653_v34  ;;  %v667_v55 = vmul.f32 %v659_v43, %v559_v22 }
  0xf3   : > { %v662_v37 = vmul.f32 %v920_v21, %v654_v24  ;;  %v668_v38 = vmul.f32 %v660_v44, %v565_v29  ;;  %v688_v58 = vrot.slane %v680_v50, %v687_v41 }
  0xf4   : > { %v663_v45 = vmul.f32 %v922_v28, %v655_v47  ;;  %v669_v40 = vmul.f32 %v661_v48, %v571_v32  ;;  %v681_v51 = vcombine.low %v666_v54, %v667_v55 }
  0xf5   : > { %v670_v36 = vmul.f32 %v662_v37, %v577_v42 }
  0xf6   : > { %v671_v49 = vmul.f32 %v663_v45, %v583_v39  ;;  %v697_v52 = vcombine.low %v668_v38, %v669_v40  ;;  %v695_v59 = vrot.slane %v681_v51, %v687_v41 }
  0xf8   : > { %v698_v53 = vcombine.low %v670_v36, %v671_v49  ;;  %v705_v57 = vrot.slane %v697_v52, %v687_v41  ;;  %v696_v61 = vcombine.low %v688_v58, %v695_v59 }
  0xfa   : > { %v712_v60 = vrot.slane %v698_v53, %v687_v41 }
  0xfc   : > { %v713_v56 = vcombine.low %v705_v57, %v712_v60 }
  0xfe   : > { %v718_v62 = vrot.slane %v713_v56, 7 }
 0x100   : > { %v720_v15 = vsel %vm719_vm4, %v718_v62, %v696_v61 }
 0x101   : > { %v722_v63 = vsel %vm721_vm5, %v718_v62, %v720_v15 }
 0x102   : > { %v724_v0 = vsel %vm723_vm6, %v718_v62, %v722_v63 }
 0x103   : > { %v726_v1 = vsel %vm725_vm7, %v718_v62, %v724_v0 }
 0x104   : > { %728 = vst [vmem:[%s259_s6] sm:$0xff] %v726_v1 }
 0x105   : > { %936 = shalt.err (!%p933_p7)
}
 0x106   : > { %s937_s20 = scalar_lea.hbm %s1235_s10, 128  ;;  %s941_s27 = scalar_lea.hbm %s1283_s4, 256 }
 0x107   : > { %p938_p10 = scmp.ne.s32.totalorder %s1235_s10, %s937_s20  ;;  %p942_p13 = scmp.lt.u32.totalorder %s1235_s10, %s1283_s4 }
 0x108   : > { %p943_p0 = scmp.lt.u32.totalorder %s941_s27, %s937_s20  ;;  %p945_p2 = scmp.lt.u32.totalorder %s937_s20, %s1235_s10 }
 0x109   : > { %p939_p11 = pnand %p938_p10, %p1058_p6 }
 0x10a   : > { %p944_p1 = por %p943_p0, %p942_p13 }
 0x10b   : > { %p940_p12 = pneg %p939_p11 }
 0x10c   : > { %p946_p3 = por %p945_p2, %p944_p1 }
 0x10e   : > { %p947_p4 = pnand %p946_p3, %p940_p12 }
 0x110   : > { %950 = shalt.err (!%p947_p4)
}
 0x111   : > { %849 = dma.vmem_to_hbm [thread:$0]  (%p1058_p6), %s1237_s7, 128, %s1235_s10, %s730_s11  }
 0x112 PF: > { %s756_s30 = sand.u32 1, %s973_s15   ;;  %p852_p5 = pnand %p832_p9, %p1062_p8 }
 0x113   : > { %s757_s5 = scalar_lea.sflag [#allocation4], %s756_s30 }
 0x114   : > { %968 = dma.done.wait (!%p852_p5), %s757_s5, 128  }
 0x115   : > { %970 = vsyncadd (!%p852_p5), %s757_s5, 4294967168  ;;  %p14_p7 = scmp.ge.s32.totalorder %s1044_s21, 4   ;;  %s1318_s15 = smov %s977_s16 }
 0x116   : > { %s1319_s16 = smov %s981_s17  ;;  %s1320_s17 = smov %s1056_s24 }
 0x117   : > { %s1321_s18 = smov %s1044_s21  ;;  %16 = sbr.rel (!%p14_p7) target bundleno = 3 (0x3), region = 105 }
 0x11e   :  { %762 = vsyncpa [#allocation4], 1 }
 0x11f   :  { %764 = vsyncpa [#allocation4 + $0x1], 1 }

</bundles_post_ra>
